<compile_context>
chip_gen: v7x
topology: tpu7x:2x2x1
jax: 0.10.0
libtpu: 0.0.40
codegen_flags: <defaults>
</compile_context>

<pallas_src>
import math

import jax
import jax.numpy as jnp
from jax.experimental import pallas as pl
from jax.experimental.pallas import tpu as pltpu


LANE = 128     # last-dim lane width
SUBLANE = 8    # second-to-last sublane width


def _round_up(n, m):
    return ((n + m - 1) // m) * m


def _choose_batch_tile(batch):
    """Return (tb, padded_batch).

    * B_p <= 256 -> single grid step (per-step overhead dwarfs any pipelining
      benefit for tiny x DMAs, and the whole batch fits one MXU-friendly tile).
    * larger B   -> 256..512-row tiles (fills the 256-row MXU on v6e/v7x),
      minimizing batch padding and preferring an even number of grid steps so
      dimension_semantics=("parallel",) splits evenly across v7x's 2 TCs.
    """
    b8 = _round_up(batch, SUBLANE)
    if b8 <= 256:
        return b8, b8
    best = None
    for tb in range(256, 512 + 1, SUBLANE):
        bp = _round_up(b8, tb)
        steps = bp // tb
        # minimize padding, then prefer even step count, then bigger tiles
        key = (bp - b8, steps % 2, -tb)
        if best is None or key < best[0]:
            best = (key, tb, bp)
    return best[1], best[2]


def _sac_actor_kernel(x_ref, w1_ref, b1_ref, w2_ref, b2_ref, w3_ref, b3_ref,
                      out_ref):
    """Fused 3-layer MLP: relu(relu(x@W1+b1)@W2+b2)@W3+b3 (bf16 in, f32 acc)."""
    x = x_ref[...]                                    # bf16 (tb, Din)

    h1 = jnp.dot(x, w1_ref[...], preferred_element_type=jnp.float32)
    h1 = jnp.maximum(h1 + b1_ref[...], 0.0)           # f32 bias + ReLU

    h2 = jnp.dot(h1.astype(jnp.bfloat16), w2_ref[...],
                 preferred_element_type=jnp.float32)
    h2 = jnp.maximum(h2 + b2_ref[...], 0.0)

    out = jnp.dot(h2.astype(jnp.bfloat16), w3_ref[...],
                  preferred_element_type=jnp.float32)
    out = out + b3_ref[...]

    # Dropout with p=0.0 (module default) is the identity; nothing to do.
    # TODO(synk): for dropout_rate > 0 use pltpu.prng_seed + prng_random_bits
    # to build a Bernoulli keep-mask and scale by 1/(1-p).
    out_ref[...] = out.astype(out_ref.dtype)          # bf16 lane-dense store


def prepare_sac_actor_params(params):
    """Pad (lanes) + cast (bf16 weights / f32 biases) ONCE, off the hot path."""
    w1, b1, w2, b2, w3, b3 = (params[k] for k in
                              ("w1", "b1", "w2", "b2", "w3", "b3"))
    Din, H = w1.shape
    Dout = w3.shape[1]
    H_p = _round_up(H, LANE)
    Dout_p = _round_up(Dout, LANE)
    bf16, f32 = jnp.bfloat16, jnp.float32

    prep = dict(
        # Din deliberately NOT padded (block dims equal to the full array dim
        # are legal and K-padding buys nothing on the MXU).
        w1=jnp.pad(w1, ((0, 0), (0, H_p - H))).astype(bf16),
        w2=jnp.pad(w2, ((0, H_p - H), (0, H_p - H))).astype(bf16),
        w3=jnp.pad(w3, ((0, H_p - H), (0, Dout_p - Dout))).astype(bf16),
        b1=jnp.pad(b1, ((0, 0), (0, H_p - H))).astype(f32),
        b2=jnp.pad(b2, ((0, 0), (0, H_p - H))).astype(f32),
        b3=jnp.pad(b3, ((0, 0), (0, Dout_p - Dout))).astype(f32),
    )
    meta = dict(input_dim=Din, hid_dim=H, output_dim=Dout,
                hid_pad=H_p, out_pad=Dout_p)
    return prep, meta


def sac_actor_forward(x, prep, meta, *, dropout_rate=0.0, batch_tile=None):
    """SACActor policy MLP (continuous=False branch) via a single pallas_call.

    x: (B, input_dim) float32; prep/meta from prepare_sac_actor_params.
    Returns (B, output_dim) float32.
    """
    if dropout_rate != 0.0:
        # TODO(synk): implement dropout_rate > 0 with an in-kernel PRNG mask.
        raise NotImplementedError("only dropout_rate=0.0 (identity) is implemented")

    B, Din = x.shape
    assert Din == meta["input_dim"], "x feature dim mismatch with params"
    H_p, Dout_p, Dout = meta["hid_pad"], meta["out_pad"], meta["output_dim"]

    if batch_tile is None:
        tb, B_p = _choose_batch_tile(B)
    else:
        tb = int(batch_tile)
        assert tb % SUBLANE == 0, "batch_tile must be a multiple of 8"
        B_p = _round_up(B, tb)
    grid = (B_p // tb,)

    x_p = x.astype(jnp.bfloat16)
    if B_p != B:
        x_p = jnp.pad(x_p, ((0, B_p - B), (0, 0)))

    # Weights/biases have constant index maps -> stay resident in VMEM; only
    # x and out are streamed over the batch grid axis (auto double-buffered).
    in_specs = [
        pl.BlockSpec((tb, Din), lambda i: (i, 0)),        # x (Din unpadded)
        pl.BlockSpec((Din, H_p), lambda i: (0, 0)),       # w1
        pl.BlockSpec((1, H_p), lambda i: (0, 0)),         # b1
        pl.BlockSpec((H_p, H_p), lambda i: (0, 0)),       # w2
        pl.BlockSpec((1, H_p), lambda i: (0, 0)),         # b2
        pl.BlockSpec((H_p, Dout_p), lambda i: (0, 0)),    # w3
        pl.BlockSpec((1, Dout_p), lambda i: (0, 0)),      # b3
    ]
    out_spec = pl.BlockSpec((tb, Dout_p), lambda i: (i, 0))

    flops = 2 * B_p * (Din * H_p + H_p * H_p + H_p * Dout_p)
    w_bytes = ((Din * H_p + H_p * H_p + H_p * Dout_p) * 2   # bf16 weights
               + (2 * H_p + Dout_p) * 4)                    # f32 biases
    bytes_accessed = x_p.size * 2 + w_bytes + B_p * Dout_p * 2   # bf16 out

    # VMEM budget: double-buffered x/out tiles + (default double-buffered)
    # resident weights + f32 intermediates, with 2x headroom.  Keeps large
    # hid_dim / tb compiling on v7x (64 MiB physical) and v5e (16 MiB default).
    est_vmem = (2 * tb * (Din + Dout_p) * 2      # x/out bf16, double-buffered
                + 2 * w_bytes                    # weights/biases, double-buffered
                + 2 * tb * H_p * 4)              # f32 h1/h2 temps
    vmem_limit = int(min(100 * 2**20, max(32 * 2**20, 2 * est_vmem)))

    out_p = pl.pallas_call(
        _sac_actor_kernel,
        out_shape=jax.ShapeDtypeStruct((B_p, Dout_p), jnp.bfloat16),
        grid_spec=pltpu.PrefetchScalarGridSpec(
            num_scalar_prefetch=0,
            grid=grid,
            in_specs=in_specs,
            out_specs=out_spec,
        ),
        compiler_params=pltpu.CompilerParams(
            dimension_semantics=("parallel",),
            vmem_limit_bytes=vmem_limit),
        cost_estimate=pl.CostEstimate(flops=flops, transcendentals=0,
                                      bytes_accessed=bytes_accessed),
    )(x_p, prep["w1"], prep["b1"], prep["w2"], prep["b2"], prep["w3"], prep["b3"])

    return out_p[:B, :Dout].astype(jnp.float32)


def init_sac_actor_params(key, input_dim, hid_dim, output_dim):
    """Deterministic init mimicking nn.Linear default (U(-1/sqrt(fan_in), +))."""
    ks = jax.random.split(key, 6)

    def linear(kw, kb, fan_in, fan_out):
        bound = 1.0 / math.sqrt(fan_in)
        w = jax.random.uniform(kw, (fan_in, fan_out), jnp.float32,
                               minval=-bound, maxval=bound)
        b = jax.random.uniform(kb, (1, fan_out), jnp.float32,
                               minval=-bound, maxval=bound)
        return w, b

    w1, b1 = linear(ks[0], ks[1], input_dim, hid_dim)
    w2, b2 = linear(ks[2], ks[3], hid_dim, hid_dim)
    w3, b3 = linear(ks[4], ks[5], hid_dim, output_dim)
    return dict(w1=w1, b1=b1, w2=w2, b2=b2, w3=w3, b3=b3)


def _reference_forward_bf16(x, p):
    """Mirrors the kernel's bf16-input / f32-accumulate numerics (f32 output)."""
    bf = jnp.bfloat16
    h1 = jnp.dot(x.astype(bf), p["w1"].astype(bf),
                 preferred_element_type=jnp.float32) + p["b1"]
    h1 = jnp.maximum(h1, 0.0)
    h2 = jnp.dot(h1.astype(bf), p["w2"].astype(bf),
                 preferred_element_type=jnp.float32) + p["b2"]
    h2 = jnp.maximum(h2, 0.0)
    return jnp.dot(h2.astype(bf), p["w3"].astype(bf),
                   preferred_element_type=jnp.float32) + p["b3"]


def _reference_forward_f32(x, p):
    h1 = jnp.maximum(x @ p["w1"] + p["b1"], 0.0)
    h2 = jnp.maximum(h1 @ p["w2"] + p["b2"], 0.0)
    return h2 @ p["w3"] + p["b3"]


if __name__ == "__main__":
    # Small shapes consistent with the module: state vectors in, action logits out.
    batch, input_dim, hid_dim, output_dim = 64, 32, 64, 8

    key = jax.random.PRNGKey(0)
    k_x, k_p = jax.random.split(key)
    x = jax.random.normal(k_x, (batch, input_dim), jnp.float32)
    params = init_sac_actor_params(k_p, input_dim, hid_dim, output_dim)

    # One-time pad/cast of weights (off the per-call hot path).
    prep, meta = prepare_sac_actor_params(params)

    out = sac_actor_forward(x, prep, meta)
    out = jax.block_until_ready(out)
    assert out.shape == (batch, output_dim)

    # Check vs. a JAX reference using identical bf16-input / f32-accum numerics
    # (tolerance covers the final bf16 rounding of the kernel output).
    ref_bf16 = _reference_forward_bf16(x, params)
    assert jnp.allclose(out, ref_bf16, atol=2e-2, rtol=2e-2), \
        "mismatch vs bf16 JAX reference"

    # Loose sanity check vs. the pure-f32 PyTorch-equivalent math.
    ref_f32 = _reference_forward_f32(x, params)
    assert jnp.allclose(out, ref_f32, atol=1e-1, rtol=1e-1), \
        "mismatch vs f32 JAX reference"

    print("KERNEL_OK")
</pallas_src>

<mosaic_0001>
module attributes {stable_mosaic.version = 11 : i64} {
  func.func @_sac_actor_kernel(%arg0: i32, %arg1: memref<64x32xbf16, #tpu.memory_space<vmem>>, %arg2: memref<32x128xbf16, #tpu.memory_space<vmem>>, %arg3: memref<1x128xf32, #tpu.memory_space<vmem>>, %arg4: memref<128x128xbf16, #tpu.memory_space<vmem>>, %arg5: memref<1x128xf32, #tpu.memory_space<vmem>>, %arg6: memref<128x128xbf16, #tpu.memory_space<vmem>>, %arg7: memref<1x128xf32, #tpu.memory_space<vmem>>, %arg8: memref<64x128xbf16, #tpu.memory_space<vmem>>) attributes {dimension_semantics = [#tpu.dimension_semantics<parallel>], iteration_bounds = array<i64: 1>, scalar_prefetch = 0 : i64, scratch_operands = 0 : i64, tpu.core_type = #tpu.core_type<tc>, window_params = [{transform_indices = @transform_0, window_bounds = array<i64: 64, 32>}, {pipeline_mode = #tpu.pipeline_mode<synchronous>, transform_indices = @transform_1, window_bounds = array<i64: 32, 128>}, {pipeline_mode = #tpu.pipeline_mode<synchronous>, transform_indices = @transform_2, window_bounds = array<i64: 1, 128>}, {pipeline_mode = #tpu.pipeline_mode<synchronous>, transform_indices = @transform_3, window_bounds = array<i64: 128, 128>}, {pipeline_mode = #tpu.pipeline_mode<synchronous>, transform_indices = @transform_4, window_bounds = array<i64: 1, 128>}, {pipeline_mode = #tpu.pipeline_mode<synchronous>, transform_indices = @transform_5, window_bounds = array<i64: 128, 128>}, {pipeline_mode = #tpu.pipeline_mode<synchronous>, transform_indices = @transform_6, window_bounds = array<i64: 1, 128>}, {transform_indices = @transform_7, window_bounds = array<i64: 64, 128>}]} {
    %c0 = arith.constant 0 : index
    %c0_0 = arith.constant 0 : index
    %0 = vector.load %arg1[%c0, %c0_0] : memref<64x32xbf16, #tpu.memory_space<vmem>>, vector<64x32xbf16>
    %c0_1 = arith.constant 0 : index
    %c0_2 = arith.constant 0 : index
    %1 = vector.load %arg2[%c0_1, %c0_2] : memref<32x128xbf16, #tpu.memory_space<vmem>>, vector<32x128xbf16>
    %cst = arith.constant dense<0.000000e+00> : vector<64x128xf32>
    %2 = tpu.matmul %0, %1, %cst {dimension_numbers = #tpu.dot_dimension_numbers<[1], [0], [0], [1], [0, 0, 1, 1], [], []>} : vector<64x32xbf16>, vector<32x128xbf16>, vector<64x128xf32> -> vector<64x128xf32>
    %c0_3 = arith.constant 0 : index
    %c0_4 = arith.constant 0 : index
    %3 = vector.load %arg3[%c0_3, %c0_4] : memref<1x128xf32, #tpu.memory_space<vmem>>, vector<1x128xf32>
    %4 = vector.broadcast %3 : vector<1x128xf32> to vector<64x128xf32>
    %5 = arith.addf %2, %4 : vector<64x128xf32>
    %cst_5 = arith.constant 0.000000e+00 : f32
    %6 = vector.broadcast %cst_5 : f32 to vector<64x128xf32>
    %7 = arith.maximumf %5, %6 : vector<64x128xf32>
    %8 = arith.truncf %7 : vector<64x128xf32> to vector<64x128xbf16>
    %c0_6 = arith.constant 0 : index
    %c0_7 = arith.constant 0 : index
    %9 = vector.load %arg4[%c0_6, %c0_7] : memref<128x128xbf16, #tpu.memory_space<vmem>>, vector<128x128xbf16>
    %cst_8 = arith.constant dense<0.000000e+00> : vector<64x128xf32>
    %10 = tpu.matmul %8, %9, %cst_8 {dimension_numbers = #tpu.dot_dimension_numbers<[1], [0], [0], [1], [0, 0, 1, 1], [], []>} : vector<64x128xbf16>, vector<128x128xbf16>, vector<64x128xf32> -> vector<64x128xf32>
    %c0_9 = arith.constant 0 : index
    %c0_10 = arith.constant 0 : index
    %11 = vector.load %arg5[%c0_9, %c0_10] : memref<1x128xf32, #tpu.memory_space<vmem>>, vector<1x128xf32>
    %12 = vector.broadcast %11 : vector<1x128xf32> to vector<64x128xf32>
    %13 = arith.addf %10, %12 : vector<64x128xf32>
    %cst_11 = arith.constant 0.000000e+00 : f32
    %14 = vector.broadcast %cst_11 : f32 to vector<64x128xf32>
    %15 = arith.maximumf %13, %14 : vector<64x128xf32>
    %16 = arith.truncf %15 : vector<64x128xf32> to vector<64x128xbf16>
    %c0_12 = arith.constant 0 : index
    %c0_13 = arith.constant 0 : index
    %17 = vector.load %arg6[%c0_12, %c0_13] : memref<128x128xbf16, #tpu.memory_space<vmem>>, vector<128x128xbf16>
    %cst_14 = arith.constant dense<0.000000e+00> : vector<64x128xf32>
    %18 = tpu.matmul %16, %17, %cst_14 {dimension_numbers = #tpu.dot_dimension_numbers<[1], [0], [0], [1], [0, 0, 1, 1], [], []>} : vector<64x128xbf16>, vector<128x128xbf16>, vector<64x128xf32> -> vector<64x128xf32>
    %c0_15 = arith.constant 0 : index
    %c0_16 = arith.constant 0 : index
    %19 = vector.load %arg7[%c0_15, %c0_16] : memref<1x128xf32, #tpu.memory_space<vmem>>, vector<1x128xf32>
    %20 = vector.broadcast %19 : vector<1x128xf32> to vector<64x128xf32>
    %21 = arith.addf %18, %20 : vector<64x128xf32>
    %22 = arith.truncf %21 : vector<64x128xf32> to vector<64x128xbf16>
    %c0_17 = arith.constant 0 : index
    %c0_18 = arith.constant 0 : index
    %23 = vector.load %arg8[%c0_17, %c0_18] : memref<64x128xbf16, #tpu.memory_space<vmem>>, vector<64x128xbf16>
    tpu.vector_store %arg8[%c0_17, %c0_18], %22 {strides = array<i32>} : memref<64x128xbf16, #tpu.memory_space<vmem>>, vector<64x128xbf16>,
    return
  }
  func.func @transform_0(%arg0: i32) -> (i32, i32) {
    %c0_i32 = arith.constant 0 : i32
    %c0_i32_0 = arith.constant 0 : i32
    return %arg0, %c0_i32 : i32, i32
  }
  func.func @transform_1(%arg0: i32) -> (i32, i32) {
    %c0_i32 = arith.constant 0 : i32
    %c0_i32_0 = arith.constant 0 : i32
    %c0_i32_1 = arith.constant 0 : i32
    return %c0_i32, %c0_i32_0 : i32, i32
  }
  func.func @transform_2(%arg0: i32) -> (i32, i32) {
    %c0_i32 = arith.constant 0 : i32
    %c0_i32_0 = arith.constant 0 : i32
    %c0_i32_1 = arith.constant 0 : i32
    return %c0_i32, %c0_i32_0 : i32, i32
  }
  func.func @transform_3(%arg0: i32) -> (i32, i32) {
    %c0_i32 = arith.constant 0 : i32
    %c0_i32_0 = arith.constant 0 : i32
    %c0_i32_1 = arith.constant 0 : i32
    return %c0_i32, %c0_i32_0 : i32, i32
  }
  func.func @transform_4(%arg0: i32) -> (i32, i32) {
    %c0_i32 = arith.constant 0 : i32
    %c0_i32_0 = arith.constant 0 : i32
    %c0_i32_1 = arith.constant 0 : i32
    return %c0_i32, %c0_i32_0 : i32, i32
  }
  func.func @transform_5(%arg0: i32) -> (i32, i32) {
    %c0_i32 = arith.constant 0 : i32
    %c0_i32_0 = arith.constant 0 : i32
    %c0_i32_1 = arith.constant 0 : i32
    return %c0_i32, %c0_i32_0 : i32, i32
  }
  func.func @transform_6(%arg0: i32) -> (i32, i32) {
    %c0_i32 = arith.constant 0 : i32
    %c0_i32_0 = arith.constant 0 : i32
    %c0_i32_1 = arith.constant 0 : i32
    return %c0_i32, %c0_i32_0 : i32, i32
  }
  func.func @transform_7(%arg0: i32) -> (i32, i32) {
    %c0_i32 = arith.constant 0 : i32
    %c0_i32_0 = arith.constant 0 : i32
    return %arg0, %c0_i32 : i32, i32
  }
}

</mosaic_0001>

<bundles_post_ra>
// kernel: tpu_custom_call.1
= control target key start
LH: loop header
LB: loop body
LE: loop exit
PB: predicated region body
PF: predicated region fallthrough
CT: control target
= control target key end

     0   :  { %12 = vsyncpa [#allocation3], 0  ;;  %s935_s0 = inlined_call_operand.vmem [shape: bf16[64,32], index: 0, kind: input, shape index: {}]   ;;  %s936_s1 = inlined_call_operand.hbm [shape: bf16[32,128], index: 1, kind: input, shape index: {}]   ;;  %s937_s2 = inlined_call_operand.vmem [shape: f32[1,128], index: 2, kind: input, shape index: {}]   ;;  %s938_s3 = inlined_call_operand.hbm [shape: bf16[128,128], index: 3, kind: input, shape index: {}]   ;;  %s939_s4 = inlined_call_operand.vmem [shape: f32[1,128], index: 4, kind: input, shape index: {}]   ;;  %s940_s5 = inlined_call_operand.vmem [shape: bf16[128,128], index: 5, kind: input, shape index: {}]   ;;  %s941_s6 = inlined_call_operand.vmem [shape: f32[1,128], index: 6, kind: input, shape index: {}]   ;;  %s942_s7 = inlined_call_operand.hbm [shape: bf16[64,128], index: 7, kind: output, shape index: {}]  }
   0x1   :  { %13 = vsyncpa [#allocation6], 0 }
   0x2   :  { %14 = vsyncpa [#allocation4], 0  ;;  %s796_s24 = smov [#allocation2]   ;;  %s724_s28 = scalar_lea.hbm %s936_s1, 256 }
   0x3   :  { %s22_s25 = sshll.u32 %s796_s24, 4  ;;  %p725_p0 = scmp.ne.s32.totalorder %s936_s1, %s724_s28  ;;  %s23_s25 = int_to_ptr.vmem [resolvable:$true] %s22_s25 }
   0x4   :  { %p728_p1 = scmp.lt.u32.totalorder %s724_s28, %s936_s1 }
   0x6   :  { %p730_p2 = pnand %p728_p1, %p725_p0 }
   0x8   :  { %733 = shalt.err (!%p730_p2)
}
   0x9   :  { %s734_s10 = scalar_lea.vmem %s23_s25, 256  ;;  %p739_p4 = scmp.lt.s32.totalorder %s23_s25, %s23_s25 }
   0xa   :  { %p735_p3 = scmp.ne.s32.totalorder %s23_s25, %s734_s10  ;;  %p740_p5 = scmp.lt.s32.totalorder %s734_s10, %s734_s10 }
   0xc   :  { %p741_p6 = por %p740_p5, %p739_p4 }
   0xe   :  { %p742_p7 = pnand %p741_p6, %p735_p3 }
  0x10   :  { %745 = shalt.err (!%p742_p7)
}
  0x11   :  { %s797_s11 = smov 64   ;;  %s798_s12 = smov 4  }
  0x12   :  { %28 = dma.hbm_to_vmem [thread:$0]  %s936_s1, 256, %s23_s25, [#allocation3], %s797_s11, %s797_s11, %s798_s12  }
  0x13   :  { %s799_s15 = smov [#allocation5]   ;;  %s746_s19 = scalar_lea.hbm %s938_s3, 1024 }
  0x14   :  { %s36_s16 = sshll.u32 %s799_s15, 4  ;;  %p747_p8 = scmp.ne.s32.totalorder %s938_s3, %s746_s19  ;;  %s37_s16 = int_to_ptr.vmem [resolvable:$true] %s36_s16 }
  0x15   :  { %p750_p9 = scmp.lt.u32.totalorder %s746_s19, %s938_s3 }
  0x17   :  { %p752_p10 = pnand %p750_p9, %p747_p8 }
  0x19   :  { %755 = shalt.err (!%p752_p10)
}
  0x1a   :  { %s756_s24 = scalar_lea.vmem %s37_s16, 1024  ;;  %p761_p12 = scmp.lt.s32.totalorder %s37_s16, %s37_s16 }
  0x1b   :  { %p757_p11 = scmp.ne.s32.totalorder %s37_s16, %s756_s24  ;;  %p762_p13 = scmp.lt.s32.totalorder %s756_s24, %s756_s24 }
  0x1d   :  { %p763_p0 = por %p762_p13, %p761_p12 }
  0x1f   :  { %p764_p1 = pnand %p763_p0, %p757_p11 }
  0x21   :  { %767 = shalt.err (!%p764_p1)
}
  0x22   :  { %42 = dma.hbm_to_vmem [thread:$0]  %s938_s3, 1024, %s37_s16, [#allocation6], %s797_s11, %s797_s11, %s798_s12  }
  0x23   :  { %790 = dma.done.wait [#allocation3], 256  }
  0x24   :  { %791 = vsyncadd [#allocation3], 4294967040 }
  0x25   :  { %792 = dma.done.wait [#allocation6], 1024  }
  0x26   :  { %793 = vsyncadd [#allocation6], 4294966272  ;;  %v702_v0 = vld [vmem:[#allocation2] sm:$0xff]   ;;  %v703_v1 = vld [vmem:[#allocation2 + $0x8] sm:$0xff]   ;;  %vm107_vm0 = vcmask 261120   ;;  %s800_s29 = smov [#allocation7]  }
  0x27   :  { %637 = vmatprep.subr.bf16.mxu0 %v702_v0  ;;  %v704_v2 = vld [vmem:[%s935_s0] sm:$0xff]   ;;  %v705_v3 = vld [vmem:[%s935_s0 + $0x8] sm:$0xff]   ;;  %v706_v4 = vld [vmem:[%s935_s0 + $0x10] sm:$0xff]   ;;  %s526_s3 = sshll.u32 %s800_s29, 4  ;;  %s527_s3 = int_to_ptr.vmem [resolvable:$true] %s526_s3 }
  0x28   :  { %638 = vmatpush3.bf16.msra.mxu0 %v702_v0  ;;  %641 = vmatprep.mubr.msk.bf16.mxu0 %vm107_vm0, %v704_v2  ;;  %v708_v5 = vld [vmem:[#allocation5] sm:$0xff]   ;;  %v709_v6 = vld [vmem:[#allocation5 + $0x8] sm:$0xff]   ;;  %v710_v7 = vld [vmem:[#allocation5 + $0x10] sm:$0xff]   ;;  %p773_p3 = scmp.lt.s32.totalorder %s527_s3, %s527_s3 }
  0x29   :  { %639 = vmatprep.subr.bf16.mxu0 %v703_v1  ;;  %649 = vmatprep.subr.bf16.mxu1 %v708_v5  ;;  %v707_v8 = vld [vmem:[%s935_s0 + $0x18] sm:$0xff]   ;;  %v711_v9 = vld [vmem:[#allocation5 + $0x18] sm:$0xff]   ;;  %v712_v10 = vld [vmem:[#allocation5 + $0x20] sm:$0xff]  }
  0x2a   :  { %650 = vmatpush3.bf16.msra.mxu1 %v708_v5  ;;  %v713_v11 = vld [vmem:[#allocation5 + $0x28] sm:$0xff]   ;;  %v714_v12 = vld [vmem:[#allocation5 + $0x30] sm:$0xff]   ;;  %v715_v13 = vld [vmem:[#allocation5 + $0x38] sm:$0xff]  }
  0x2b   :  { %651 = vmatprep.subr.bf16.mxu1 %v709_v6  ;;  %v716_v14 = vld [vmem:[%s940_s5] sm:$0xff]   ;;  %v717_v15 = vld [vmem:[%s940_s5 + $0x8] sm:$0xff]   ;;  %v718_v16 = vld [vmem:[%s940_s5 + $0x10] sm:$0xff]  }
  0x2c   :  { %640 = vmatpush3.bf16.msra.mxu0 %v703_v1  ;;  %v719_v17 = vld [vmem:[%s940_s5 + $0x18] sm:$0xff]   ;;  %v720_v18 = vld [vmem:[%s940_s5 + $0x20] sm:$0xff]   ;;  %v721_v19 = vld [vmem:[%s940_s5 + $0x28] sm:$0xff]  }
  0x2d   :  { %673 = vmatprep.subr.bf16.mxu0 %v716_v14  ;;  %v539_v20 = vld [vmem:[%s937_s2] ss:$0 sm:$0xff]  ;;  %v722_v49 = vld [vmem:[%s940_s5 + $0x30] sm:$0xff]   ;;  %v723_v50 = vld [vmem:[%s940_s5 + $0x38] sm:$0xff]  }
  0x2e   :  { %652 = vmatpush3.bf16.msra.mxu1 %v709_v6  ;;  %v550_v51 = vld [vmem:[%s939_s4] ss:$0 sm:$0xff] }
  0x2f   :  { %642 = vmatmul.mubr.msk.bf16.vlgmr.msra.gmra.mrb[0].mxu0 %vm107_vm0, %v705_v3  ;;  %653 = vmatprep.subr.bf16.mxu1 %v710_v7 }
  0x30   :  { %645 = vmatprep.mubr.msk.bf16.mxu0 %vm107_vm0, %v706_v4  ;;  %674 = vmatpush3.bf16.msra.mxu0 %v716_v14 }
  0x31   :  { %675 = vmatprep.subr.bf16.mxu0 %v717_v15 }
  0x32   :  { %654 = vmatpush3.bf16.msra.mxu1 %v710_v7 }
  0x33   :  { %655 = vmatprep.subr.bf16.mxu1 %v711_v9 }
  0x34   :  { %676 = vmatpush3.bf16.msra.mxu0 %v717_v15 }
  0x35   :  { %677 = vmatprep.subr.bf16.mxu0 %v718_v16 }
  0x36   :  { %656 = vmatpush3.bf16.msra.mxu1 %v711_v9 }
  0x37   :  { %646 = vmatmul.mubr.msk.bf16.gmra.mrb[4].mxu0 %vm107_vm0, %v707_v8  ;;  %657 = vmatprep.subr.bf16.mxu1 %v712_v10 }
  0x38   :  { %678 = vmatpush3.bf16.msra.mxu0 %v718_v16 }
  0x39   :  { %679 = vmatprep.subr.bf16.mxu0 %v719_v17 }
  0x3a   :  { %658 = vmatpush3.bf16.msra.mxu1 %v712_v10 }
  0x3b   :  { %659 = vmatprep.subr.bf16.mxu1 %v713_v11 }
  0x3c   :  { %680 = vmatpush3.bf16.msra.mxu0 %v719_v17  ;;  %v559_v17 = vld [vmem:[%s941_s6] ss:$0 sm:$0xff]  ;;  %s768_s6 = scalar_lea.vmem %s527_s3, 512 }
  0x3d   :  { %681 = vmatprep.subr.bf16.mxu0 %v720_v18  ;;  %p769_p2 = scmp.ne.s32.totalorder %s527_s3, %s768_s6  ;;  %p774_p4 = scmp.lt.s32.totalorder %s768_s6, %s768_s6 }
  0x3e   :  { %660 = vmatpush3.bf16.msra.mxu1 %v713_v11 }
  0x3f   :  { %661 = vmatprep.subr.bf16.mxu1 %v714_v12  ;;  %p775_p5 = por %p774_p4, %p773_p3 }
  0x40   :  { %682 = vmatpush3.bf16.msra.mxu0 %v720_v18 }
  0x41   :  { %683 = vmatprep.subr.bf16.mxu0 %v721_v19  ;;  %p776_p6 = pnand %p775_p5, %p769_p2 }
  0x42   :  { %662 = vmatpush3.bf16.msra.mxu1 %v714_v12 }
  0x43   :  { %663 = vmatprep.subr.bf16.mxu1 %v715_v13 }
  0x44   :  { %684 = vmatpush3.bf16.msra.mxu0 %v721_v19 }
  0x45   :  { %685 = vmatprep.subr.bf16.mxu0 %v722_v49 }
  0x46   :  { %664 = vmatpush3.bf16.msra.mxu1 %v715_v13 }
  0x48   :  { %686 = vmatpush3.bf16.msra.mxu0 %v722_v49 }
  0x49   :  { %687 = vmatprep.subr.bf16.mxu0 %v723_v50 }
  0x4c   :  { %688 = vmatpush3.bf16.msra.mxu0 %v723_v50 }
 0x102   :  { %v643_v21 = vpop.f32.mrb[0].mxu0 }
 0x103   :  { %v163_v22 = vadd.f32 %v643_v21, %v539_v20  ;;  %v154_v23 = vpop.f32.mrb[1].mxu0 }
 0x104   :  { %v155_v24 = vadd.f32 %v539_v20, %v154_v23  ;;  %v644_v25 = vpop.f32.mrb[2].mxu0 }
 0x105   :  { %v166_v26 = vadd.f32 %v644_v25, %v539_v20  ;;  %v157_v27 = vpop.f32.mrb[3].mxu0  ;;  %v187_v29 = vmax.f32 %v163_v22, 0.0 }
 0x106   :  { %v158_v28 = vadd.f32 %v539_v20, %v157_v27  ;;  %v185_v31 = vmax.f32 %v155_v24, 0.0 }
 0x107   :  { %v188_v30 = vmax.f32 %v166_v26, 0.0 }
 0x108   :  { %v186_v32 = vmax.f32 %v158_v28, 0.0 }
 0x109   :  { %v194_v33 = vpack.c.bf16 %v188_v30, %v187_v29 }
 0x10a   :  { %v647_v34 = vpop.f32.mrb[4].mxu0  ;;  %v193_v35 = vpack.c.bf16 %v186_v32, %v185_v31 }
 0x10b   :  { %v179_v36 = vadd.f32 %v647_v34, %v539_v20  ;;  %v170_v37 = vpop.f32.mrb[5].mxu0 }
 0x10c   :  { %v171_v38 = vadd.f32 %v539_v20, %v170_v37  ;;  %v648_v39 = vpop.f32.mrb[6].mxu0  ;;  %665 = vmatprep.mubr.bf16.mxu1 %v193_v35 }
 0x10d   :  { %v182_v40 = vadd.f32 %v648_v39, %v539_v20  ;;  %v173_v41 = vpop.f32.mrb[7].mxu0  ;;  %666 = vmatmul.mubr.bf16.vlgmr.msra.gmra.mrb[0].mxu1 %v194_v33  ;;  %v191_v43 = vmax.f32 %v179_v36, 0.0 }
 0x10e   :  { %v174_v42 = vadd.f32 %v539_v20, %v173_v41  ;;  %v189_v45 = vmax.f32 %v171_v38, 0.0 }
 0x10f   :  { %v192_v44 = vmax.f32 %v182_v40, 0.0 }
 0x110   :  { %v190_v46 = vmax.f32 %v174_v42, 0.0 }
 0x111   :  { %v196_v47 = vpack.c.bf16 %v192_v44, %v191_v43 }
 0x112   :  { %v195_v48 = vpack.c.bf16 %v190_v46, %v189_v45 }
 0x114   :  { %669 = vmatprep.mubr.bf16.mxu1 %v195_v48 }
 0x115   :  { %670 = vmatmul.mubr.bf16.gmra.mrb[4].mxu1 %v196_v47 }
 0x1e0   :  { %v667_v52 = vpop.f32.mrb[0].mxu1 }
 0x1e1   :  { %v311_v53 = vadd.f32 %v667_v52, %v550_v51  ;;  %v302_v54 = vpop.f32.mrb[1].mxu1 }
 0x1e2   :  { %v303_v55 = vadd.f32 %v550_v51, %v302_v54  ;;  %v668_v56 = vpop.f32.mrb[2].mxu1 }
 0x1e3   :  { %v314_v57 = vadd.f32 %v668_v56, %v550_v51  ;;  %v305_v58 = vpop.f32.mrb[3].mxu1  ;;  %v335_v60 = vmax.f32 %v311_v53, 0.0 }
 0x1e4   :  { %v306_v59 = vadd.f32 %v550_v51, %v305_v58  ;;  %v333_v62 = vmax.f32 %v303_v55, 0.0 }
 0x1e5   :  { %v336_v61 = vmax.f32 %v314_v57, 0.0 }
 0x1e6   :  { %v334_v63 = vmax.f32 %v306_v59, 0.0 }
 0x1e7   :  { %v342_v0 = vpack.c.bf16 %v336_v61, %v335_v60 }
 0x1e8   :  { %v341_v1 = vpack.c.bf16 %v334_v63, %v333_v62  ;;  %v671_v2 = vpop.f32.mrb[4].mxu1 }
 0x1e9   :  { %v327_v3 = vadd.f32 %v671_v2, %v550_v51  ;;  %v318_v4 = vpop.f32.mrb[5].mxu1 }
 0x1ea   :  { %v319_v5 = vadd.f32 %v550_v51, %v318_v4  ;;  %v672_v6 = vpop.f32.mrb[6].mxu1  ;;  %689 = vmatprep.mubr.bf16.mxu0 %v341_v1 }
 0x1eb   :  { %v330_v7 = vadd.f32 %v672_v6, %v550_v51  ;;  %v321_v8 = vpop.f32.mrb[7].mxu1  ;;  %690 = vmatmul.mubr.bf16.vlgmr.msra.gmra.mrb[8].mxu0 %v342_v0  ;;  %v339_v10 = vmax.f32 %v327_v3, 0.0 }
 0x1ec   :  { %v322_v9 = vadd.f32 %v550_v51, %v321_v8  ;;  %v337_v12 = vmax.f32 %v319_v5, 0.0 }
 0x1ed   :  { %v340_v11 = vmax.f32 %v330_v7, 0.0 }
 0x1ee   :  { %v338_v13 = vmax.f32 %v322_v9, 0.0 }
 0x1ef   :  { %v344_v14 = vpack.c.bf16 %v340_v11, %v339_v10 }
 0x1f0   :  { %v343_v15 = vpack.c.bf16 %v338_v13, %v337_v12 }
 0x1f2   :  { %693 = vmatprep.mubr.bf16.mxu0 %v343_v15 }
 0x1f3   :  { %694 = vmatmul.mubr.bf16.gmra.mrb[12].mxu0 %v344_v14 }
 0x2be   :  { %v691_v16 = vpop.f32.mrb[8].mxu0 }
 0x2bf   :  { %v450_v18 = vpop.f32.mrb[9].mxu0  ;;  %v459_v20 = vadd.f32 %v691_v16, %v559_v17 }
 0x2c0   :  { %v692_v19 = vpop.f32.mrb[10].mxu0  ;;  %v451_v23 = vadd.f32 %v559_v17, %v450_v18 }
 0x2c1   :  { %v462_v21 = vadd.f32 %v692_v19, %v559_v17  ;;  %v453_v22 = vpop.f32.mrb[11].mxu0 }
 0x2c2   :  { %v454_v24 = vadd.f32 %v559_v17, %v453_v22 }
 0x2c3   :  { %v592_v25 = vpack.c.bf16 %v462_v21, %v459_v20 }
 0x2c4   :  { %v587_v26 = vpack.c.bf16 %v454_v24, %v451_v23 }
 0x2c5   :  { %604 = vst [vmem:[#allocation7 + $0x8] sm:$0xff] %v592_v25  }
 0x2c6   :  { %588 = vst [vmem:[#allocation7] sm:$0xff] %v587_v26   ;;  %v695_v27 = vpop.f32.mrb[12].mxu0 }
 0x2c7   :  { %v466_v28 = vpop.f32.mrb[13].mxu0  ;;  %v475_v30 = vadd.f32 %v695_v27, %v559_v17 }
 0x2c8   :  { %v696_v29 = vpop.f32.mrb[14].mxu0  ;;  %v467_v33 = vadd.f32 %v559_v17, %v466_v28 }
 0x2c9   :  { %v478_v31 = vadd.f32 %v696_v29, %v559_v17  ;;  %v469_v32 = vpop.f32.mrb[15].mxu0 }
 0x2ca   :  { %v470_v34 = vadd.f32 %v559_v17, %v469_v32 }
 0x2cb   :  { %v602_v35 = vpack.c.bf16 %v478_v31, %v475_v30 }
 0x2cc   :  { %v597_v36 = vpack.c.bf16 %v470_v34, %v467_v33 }
 0x2cd   :  { %606 = vst [vmem:[#allocation7 + $0x18] sm:$0xff] %v602_v35  }
 0x2ce   :  { %605 = vst [vmem:[#allocation7 + $0x10] sm:$0xff] %v597_v36  }
 0x2cf   :  { %779 = shalt.err (!%p776_p6)
}
 0x2d0   :  { %s780_s9 = scalar_lea.hbm %s942_s7, 512 }
 0x2d1   :  { %p781_p7 = scmp.ne.s32.totalorder %s942_s7, %s780_s9  ;;  %p784_p8 = scmp.lt.u32.totalorder %s780_s9, %s942_s7 }
 0x2d3   :  { %p786_p9 = pnand %p784_p8, %p781_p7 }
 0x2d5   :  { %789 = shalt.err (!%p786_p9)
}
 0x2d6   :  { %532 = dma.vmem_to_hbm [thread:$0]  %s527_s3, 512, %s942_s7, [#allocation4], %s797_s11, %s797_s11, %s798_s12  }
 0x2d7   :  { %794 = dma.done.wait [#allocation4], 512  }
 0x2d8   :  { %795 = vsyncadd [#allocation4], 4294966784 }
 0x2d9   :  { %536 = vsyncpa [#allocation3], 1 }
 0x2da   :  { %537 = vsyncpa [#allocation6], 1 }
 0x2db   :  { %538 = vsyncpa [#allocation4], 1 }

</bundles_post_ra>
